<compile_context>
chip_gen: v5e
topology: v5e:2x2
jax: 0.10.0
libtpu: 0.0.40
codegen_flags: <defaults>
</compile_context>

<pallas_src>
import jax
import jax.numpy as jnp
from jax import lax
from jax.experimental import pallas as pl
from jax.experimental.pallas import tpu as pltpu

EPS = 1e-12  # F.normalize default eps


def _cosine_sim_linear_kernel(x_ref, w_ref, rs_ref, cs_ref, o_ref, acc_ref):
    # x_ref:   (tm, tk)  raw row tile of x
    # w_ref:   (tk, tn)  raw weight slab
    # rs_ref:  (tm, 1)   1 / max(||x_row||, eps)       (f32, precomputed)
    # cs_ref:  (1, tn)   scale / max(||w_col||, eps)   (f32, precomputed)
    # o_ref:   (tm, tn)  output tile
    # acc_ref: (tm, tn)  f32 accumulator (VMEM scratch, resident across K steps)
    k = pl.program_id(2)

    @pl.when(k == 0)
    def _():
        acc_ref[...] = jnp.zeros_like(acc_ref)

    acc_ref[...] += jnp.dot(x_ref[...], w_ref[...],
                            preferred_element_type=jnp.float32)

    @pl.when(k == pl.num_programs(2) - 1)
    def _():
        o_ref[...] = (acc_ref[...] * rs_ref[...] * cs_ref[...]).astype(o_ref.dtype)


def _vmem_limit_bytes():
    # ~3/4 of physical VMEM: ~96 MiB on v5e/v6e (128 MiB), ~48 MiB on v7x (64 MiB).
    try:
        return int(pltpu.get_tpu_info().vmem_capacity_bytes) * 3 // 4
    except Exception:
        return 48 * 1024 * 1024


def _pick_tk(dim_in, tm, tn, in_bytes, out_bytes, budget):
    """Largest K tile that fits `budget`: either full dim_in (untiled) or a
    multiple of 128 that divides dim_in (so no ragged K block ever occurs)."""
    fixed = 2 * tm * tn * out_bytes + tm * tn * 4 + 2 * (tm + tn) * 4
    avail = max(budget - fixed, 0)
    per_k = 2 * (tm + tn) * in_bytes  # double-buffered x- and w-slab bytes per K element
    max_tk = avail // per_k if per_k else dim_in
    if dim_in <= max_tk:
        return dim_in
    tk = int(max_tk // 128) * 128
    while tk >= 128 and dim_in % tk != 0:
        tk -= 128
    return tk if tk >= 128 else dim_in  # fall back to untiled K


def cosine_sim_linear(x, weight, scale=1.0, *, tm=512, tn=512):
    """x: (..., dim_in), weight: (dim_in, dim_out) -> (..., dim_out)."""
    *lead, dim_in = x.shape
    dim_in_w, dim_out = weight.shape
    assert dim_in == dim_in_w, "last dim of x must match weight dim_in"

    x2d = x.reshape(-1, dim_in)
    M = x2d.shape[0]

    # ---- hoisted normalization (computed once; tiny outputs) ----
    xf = x2d.astype(jnp.float32)
    row_scale = lax.rsqrt(
        jnp.maximum(jnp.sum(xf * xf, axis=-1, keepdims=True), EPS * EPS))   # (M, 1)
    wf = weight.astype(jnp.float32)
    col_scale = (scale / jnp.maximum(jnp.sqrt(jnp.sum(wf * wf, axis=0)), EPS)
                 ).reshape(1, dim_out).astype(jnp.float32)                  # (1, dim_out)

    # ---- pad dim_out to a lane-dense multiple of 128 (weight only; x untouched) ----
    N_pad = pl.cdiv(dim_out, 128) * 128
    w, cs = weight, col_scale
    if N_pad != dim_out:
        w = jnp.pad(w, ((0, 0), (0, N_pad - dim_out)))
        cs = jnp.pad(cs, ((0, 0), (0, N_pad - dim_out)))

    # ---- tile selection ----
    in_bytes = jnp.dtype(x.dtype).itemsize
    out_bytes = in_bytes
    sub = max(8, 32 // in_bytes)  # sublane packing: 8 (f32) / 16 (bf16) / 32 (int8)

    tm_eff = tm if M >= tm else max(sub, pl.cdiv(M, sub) * sub)
    tn_eff = min(tn, N_pad)

    gm = pl.cdiv(M, tm_eff)
    gn = pl.cdiv(N_pad, tn_eff)
    # v7x has 2 TensorCores: ensure at least one parallel axis has >= 2 tiles.
    if gm == 1 and gn == 1 and tm_eff >= 2 * sub:
        tm_eff = pl.cdiv(tm_eff // 2, sub) * sub
        gm = pl.cdiv(M, tm_eff)

    vmem_limit = _vmem_limit_bytes()
    tk = _pick_tk(dim_in, tm_eff, tn_eff, in_bytes, out_bytes, budget=vmem_limit // 2)
    gk = pl.cdiv(dim_in, tk)

    out2d = pl.pallas_call(
        _cosine_sim_linear_kernel,
        out_shape=jax.ShapeDtypeStruct((M, N_pad), x.dtype),
        grid_spec=pltpu.PrefetchScalarGridSpec(
            num_scalar_prefetch=0,
            # Weight-stationary order: N tiles outer, M tiles inner, K innermost.
            grid=(gn, gm, gk),
            in_specs=[
                pl.BlockSpec((tm_eff, tk), lambda j, i, k: (i, k)),   # x row tile
                pl.BlockSpec((tk, tn_eff), lambda j, i, k: (k, j)),   # weight slab (stationary over i)
                pl.BlockSpec((tm_eff, 1), lambda j, i, k: (i, 0)),    # per-row scale
                pl.BlockSpec((1, tn_eff), lambda j, i, k: (0, j)),    # per-column scale
            ],
            out_specs=pl.BlockSpec((tm_eff, tn_eff), lambda j, i, k: (i, j)),
            scratch_shapes=[pltpu.VMEM((tm_eff, tn_eff), jnp.float32)],
        ),
        compiler_params=pltpu.CompilerParams(
            dimension_semantics=("parallel", "parallel", "arbitrary"),
            vmem_limit_bytes=vmem_limit,
        ),
    )(x2d, w, row_scale, cs)

    if N_pad != dim_out:
        out2d = out2d[:, :dim_out]
    return out2d.reshape(*lead, dim_out)


def _reference(x, weight, scale=1.0):
    xn = x / jnp.maximum(jnp.linalg.norm(x, axis=-1, keepdims=True), EPS)
    wn = weight / jnp.maximum(jnp.linalg.norm(weight, axis=0, keepdims=True), EPS)
    return (xn @ wn) * scale


if __name__ == "__main__":
    key = jax.random.PRNGKey(0)
    k_x, k_w = jax.random.split(key)

    batch, seq, dim_in, dim_out = 2, 8, 32, 64
    scale = 1.0

    # Matches nn.Parameter(torch.randn(dim_in, dim_out)) shape.
    weight = jax.random.normal(k_w, (dim_in, dim_out), dtype=jnp.float32)
    x = jax.random.normal(k_x, (batch, seq, dim_in), dtype=jnp.float32)

    out = cosine_sim_linear(x, weight, scale)
    out = jax.block_until_ready(out)

    ref = _reference(x, weight, scale)
    assert out.shape == (batch, seq, dim_out)
    assert jnp.allclose(out, ref, atol=1e-5, rtol=1e-5), "mismatch vs reference"

    print("KERNEL_OK")
</pallas_src>

<mosaic_0001>
module attributes {stable_mosaic.version = 11 : i64} {
  func.func @_cosine_sim_linear_kernel(%arg0: i32, %arg1: i32, %arg2: i32, %arg3: memref<8x32xf32, #tpu.memory_space<vmem>>, %arg4: memref<32x128xf32, #tpu.memory_space<vmem>>, %arg5: memref<8x1xf32, #tpu.memory_space<vmem>>, %arg6: memref<1x128xf32, #tpu.memory_space<vmem>>, %arg7: memref<8x128xf32, #tpu.memory_space<vmem>>, %arg8: memref<8x128xf32, #tpu.memory_space<vmem>>) attributes {dimension_semantics = [#tpu.dimension_semantics<parallel>, #tpu.dimension_semantics<parallel>, #tpu.dimension_semantics<arbitrary>], iteration_bounds = array<i64: 1, 2, 1>, scalar_prefetch = 0 : i64, scratch_operands = 1 : i64, tpu.core_type = #tpu.core_type<tc>, window_params = [{transform_indices = @transform_0, window_bounds = array<i64: 8, 32>}, {transform_indices = @transform_1, window_bounds = array<i64: 32, 128>}, {transform_indices = @transform_2, window_bounds = array<i64: 8, 1>}, {transform_indices = @transform_3, window_bounds = array<i64: 1, 128>}, {transform_indices = @transform_4, window_bounds = array<i64: 8, 128>}]} {
    %c0_i32 = arith.constant 0 : i32
    %0 = arith.cmpi eq, %arg2, %c0_i32 : i32
    %1 = arith.extui %0 : i1 to i32
    %c0_i32_0 = arith.constant 0 : i32
    %2 = arith.cmpi ne, %1, %c0_i32_0 : i32
    scf.if %2 {
      %cst_10 = arith.constant 0.000000e+00 : f32
      %12 = vector.broadcast %cst_10 : f32 to vector<8x128xf32>
      %c0_11 = arith.constant 0 : index
      %c0_12 = arith.constant 0 : index
      %13 = vector.load %arg8[%c0_11, %c0_12] : memref<8x128xf32, #tpu.memory_space<vmem>>, vector<8x128xf32>
      tpu.vector_store %arg8[%c0_11, %c0_12], %12 {strides = array<i32>} : memref<8x128xf32, #tpu.memory_space<vmem>>, vector<8x128xf32>,
    } else {
    }
    %c0 = arith.constant 0 : index
    %c0_1 = arith.constant 0 : index
    %3 = vector.load %arg8[%c0, %c0_1] : memref<8x128xf32, #tpu.memory_space<vmem>>, vector<8x128xf32>
    %c0_2 = arith.constant 0 : index
    %c0_3 = arith.constant 0 : index
    %4 = vector.load %arg3[%c0_2, %c0_3] : memref<8x32xf32, #tpu.memory_space<vmem>>, vector<8x32xf32>
    %c0_4 = arith.constant 0 : index
    %c0_5 = arith.constant 0 : index
    %5 = vector.load %arg4[%c0_4, %c0_5] : memref<32x128xf32, #tpu.memory_space<vmem>>, vector<32x128xf32>
    %cst = arith.constant dense<0.000000e+00> : vector<8x128xf32>
    %6 = tpu.matmul %4, %5, %cst {dimension_numbers = #tpu.dot_dimension_numbers<[1], [0], [0], [1], [0, 0, 1, 1], [], []>} : vector<8x32xf32>, vector<32x128xf32>, vector<8x128xf32> -> vector<8x128xf32>
    %7 = arith.addf %3, %6 : vector<8x128xf32>
    %c0_6 = arith.constant 0 : index
    %c0_7 = arith.constant 0 : index
    %8 = vector.load %arg8[%c0_6, %c0_7] : memref<8x128xf32, #tpu.memory_space<vmem>>, vector<8x128xf32>
    tpu.vector_store %arg8[%c0_6, %c0_7], %7 {strides = array<i32>} : memref<8x128xf32, #tpu.memory_space<vmem>>, vector<8x128xf32>,
    %c0_i32_8 = arith.constant 0 : i32
    %9 = arith.cmpi eq, %arg2, %c0_i32_8 : i32
    %10 = arith.extui %9 : i1 to i32
    %c0_i32_9 = arith.constant 0 : i32
    %11 = arith.cmpi ne, %10, %c0_i32_9 : i32
    scf.if %11 {
      %c0_10 = arith.constant 0 : index
      %c0_11 = arith.constant 0 : index
      %12 = vector.load %arg8[%c0_10, %c0_11] : memref<8x128xf32, #tpu.memory_space<vmem>>, vector<8x128xf32>
      %c0_12 = arith.constant 0 : index
      %c0_13 = arith.constant 0 : index
      %13 = vector.load %arg5[%c0_12, %c0_13] : memref<8x1xf32, #tpu.memory_space<vmem>>, vector<8x1xf32>
      %14 = vector.broadcast %13 : vector<8x1xf32> to vector<8x128xf32>
      %15 = arith.mulf %12, %14 : vector<8x128xf32>
      %c0_14 = arith.constant 0 : index
      %c0_15 = arith.constant 0 : index
      %16 = vector.load %arg6[%c0_14, %c0_15] : memref<1x128xf32, #tpu.memory_space<vmem>>, vector<1x128xf32>
      %17 = vector.broadcast %16 : vector<1x128xf32> to vector<8x128xf32>
      %18 = arith.mulf %15, %17 : vector<8x128xf32>
      %c0_16 = arith.constant 0 : index
      %c0_17 = arith.constant 0 : index
      %19 = vector.load %arg7[%c0_16, %c0_17] : memref<8x128xf32, #tpu.memory_space<vmem>>, vector<8x128xf32>
      tpu.vector_store %arg7[%c0_16, %c0_17], %18 {strides = array<i32>} : memref<8x128xf32, #tpu.memory_space<vmem>>, vector<8x128xf32>,
    } else {
    }
    return
  }
  func.func @transform_0(%arg0: i32, %arg1: i32, %arg2: i32) -> (i32, i32) {
    %c0_i32 = arith.constant 0 : i32
    return %arg1, %arg2 : i32, i32
  }
  func.func @transform_1(%arg0: i32, %arg1: i32, %arg2: i32) -> (i32, i32) {
    %c0_i32 = arith.constant 0 : i32
    return %arg2, %arg0 : i32, i32
  }
  func.func @transform_2(%arg0: i32, %arg1: i32, %arg2: i32) -> (i32, i32) {
    %c0_i32 = arith.constant 0 : i32
    %c0_i32_0 = arith.constant 0 : i32
    return %arg1, %c0_i32 : i32, i32
  }
  func.func @transform_3(%arg0: i32, %arg1: i32, %arg2: i32) -> (i32, i32) {
    %c0_i32 = arith.constant 0 : i32
    %c0_i32_0 = arith.constant 0 : i32
    return %c0_i32, %arg0 : i32, i32
  }
  func.func @transform_4(%arg0: i32, %arg1: i32, %arg2: i32) -> (i32, i32) {
    %c0_i32 = arith.constant 0 : i32
    return %arg1, %arg0 : i32, i32
  }
}

</mosaic_0001>

<bundles_post_ra>
// kernel: tpu_custom_call.1
= control target key start
LH: loop header
LB: loop body
LE: loop exit
PB: predicated region body
PF: predicated region fallthrough
CT: control target
= control target key end

     0   :  { %9 = vsyncpa [#allocation4], 0  ;;  %s806_s0 = inlined_call_operand.vmem [shape: f32[16,32], index: 0, kind: input, shape index: {}]   ;;  %s807_s1 = inlined_call_operand.hbm [shape: f32[32,128], index: 1, kind: input, shape index: {}]   ;;  %s808_s2 = inlined_call_operand.vmem [shape: f32[16,1], index: 2, kind: input, shape index: {}]   ;;  %s809_s3 = inlined_call_operand.vmem [shape: f32[1,128], index: 3, kind: input, shape index: {}]   ;;  %s810_s4 = inlined_call_operand.hbm [shape: f32[16,128], index: 4, kind: output, shape index: {}]  }
   0x1   :  { %10 = vsyncpa [#allocation5], 0 }
   0x2   :  { %12 = vsyncpa [#allocation5 + $0x1], 0  ;;  %s700_s15 = smov 0   ;;  %s702_s16 = smov 0  }
   0x3   :  { %s704_s17 = smov 0   ;;  %s706_s18 = smov 0  }
   0x4   :  { %s708_s19 = smov 0   ;;  %s710_s20 = smov 0  }
   0x5 LB: > { %s470_s21 = sadd.s32 4294967295, %s669_s20   ;;  %s471_s22 = sadd.s32 4294967294, %s669_s20   ;;  %s669_s20 = sphi %s710_s20, %s18_s20   ;;  %s665_s19 = sphi %s708_s19, %s817_s19   ;;  %s661_s18 = sphi %s706_s18, %s816_s18   ;;  %s657_s17 = sphi %s704_s17, %s815_s17   ;;  %s653_s16 = sphi %s702_s16, %s814_s16   ;;  %s649_s15 = sphi %s700_s15, %s813_s15  }
   0x6   : > { %s33_s23 = sadd.s32 1, %s665_s19  ;;  %s154_s24 = sadd.s32 1, %s657_s17 }
   0x7   : > { %p35_p0 = scmp.ge.s32.totalorder %s33_s23, 2  ;;  %p164_p1 = scmp.ne.s32.totalorder %s657_s17, %s653_s16 }
   0x8   : > { %p165_p2 = scmp.eq.s32.totalorder %s470_s21, 1  ;;  %p170_p3 = scmp.ne.s32.totalorder %s653_s16, %s649_s15 }
   0x9   : > { %s819_s23 = smov (%p35_p0, %s33_s23), 0  ;;  %p171_p5 = scmp.eq.s32.totalorder %s471_s22, 1 }
   0xa   : > { %p740_p4 = por %p165_p2, %p164_p1  ;;  %s149_s26 = ssub.s32 %s665_s19, %s819_s23 }
   0xb   : > { %p472_p6 = scmp.ge.s32.totalorder %s669_s20, 1  ;;  %p152_p7 = scmp.eq.s32.totalorder %s149_s26, 0 }
   0xc   : > { %p747_p8 = por %p171_p5, %p170_p3  ;;  %p178_p9 = scmp.lt.s32.totalorder %s669_s20, 3 }
   0xd   : > { %s753_s28 = scalar_select %p152_p7, %s657_s17, %s154_s24  }
   0xe   : > { %p179_p10 = pnand %p472_p6, %p178_p9  ;;  %p500_p11 = scmp.eq.s32.totalorder %s470_s21, 0 }
   0xf   : > { %s193_s5 = sshll.u32 %s807_s1, 4  ;;  %s671_s6 = smov [#allocation3]   ;;  %s194_s5 = int_to_ptr.hbm [resolvable:$true] %s193_s5 }
  0x10   : > { %p492_p12 = pneg %p179_p10  ;;  %s195_s7 = sshll.u32 %s671_s6, 4  ;;  %s196_s7 = int_to_ptr.vmem [resolvable:$true] %s195_s7 }
  0x11   : > { %s672_s8 = smov 128   ;;  %s673_s9 = smov 8  }
  0x12   : > { %p493_p13 = pnand %p500_p11, %p492_p12  ;;  %234 = sbr.rel (%p179_p10) target bundleno = 165 (0xa5), region = 36 }
  0x14   : > { %495 = dma.hbm_to_vmem [thread:$0]  (!%p493_p13), %s194_s5, 512, %s196_s7, [#allocation4], %s672_s8, %s672_s8, %s673_s9  }
  0x17   : > { %640 = dma.done.wait (%p500_p11), [#allocation4], 512  }
  0x18   : > { %642 = vsyncadd (%p500_p11), [#allocation4], 4294966784  ;;  %p270_p0 = scmp.lt.s32.totalorder %s661_s18, 1  ;;  %v674_v0 = vmov 0   ;;  %v295_v1 = vld [vmem:[#allocation3 + $0x18] sm:$0xff]  ;;  %v294_v2 = vld [vmem:[#allocation3 + $0x10] sm:$0xff] }
  0x19   : > { %555 = vset.pattern.permute.xlu0 %v674_v0  ;;  %312 = vmatpush.msra.mxu0 %v295_v1  ;;  %v293_v4 = vld [vmem:[#allocation3 + $0x8] sm:$0xff]  ;;  %v292_v5 = vld [vmem:[#allocation3] sm:$0xff]  ;;  %vm296_vm0 = vcmask 261120   ;;  %s267_s26 = sand.u32 1, %s653_s16   ;;  %s483_s30 = sshll.u32 %s661_s18, 3 }
  0x1a   : > { %s271_s10 = scalar_select %p270_p0, %s661_s18, 1  ;;  %v556_v8 = vld [vmem:[%s809_s3] ss:$0 sm:$0xff] }
  0x1b   : > { %313 = vmatpush.msra.mxu0 %v294_v2  ;;  %s478_s29 = sshll.u32 %s267_s26, 3  ;;  %s351_s7 = scalar_lea.hbm %s810_s4, %s483_s30 }
  0x1c   : > { %s479_s11 = sshll.u32 %s271_s10, 3  ;;  %s269_s10 = scalar_lea.vmem [#allocation6], %s478_s29 }
  0x1d   : > { %s281_s14 = scalar_lea.vmem %s808_s2, %s479_s11  ;;  %s276_s24 = scalar_lea.vmem %s806_s0, %s479_s11  ;;  %314 = vmatpush.msra.mxu0 %v293_v4 }
  0x1e   : > { %v326_v3 = vld [vmem:[%s281_s14] sm:$0xff]  ;;  %s353_s11 = sshll.u32 %s269_s10, 4  ;;  %s355_s12 = sshll.u32 %s351_s7, 4  ;;  %s354_s11 = int_to_ptr.vmem [resolvable:$true] %s353_s11  ;;  %s356_s12 = int_to_ptr.hbm [resolvable:$true] %s355_s12 }
  0x1f   : > { %329 = vperm.xlu0 %555, %v326_v3   ;;  %v291_v6 = vld [vmem:[%s276_s24] sm:$0xff]  ;;  %315 = vmatpush.msra.mxu0 %v292_v5  ;;  %s340_s18 = scalar_lea.sflag [#allocation5], %s267_s26  ;;  %s601_s13 = sshra.s32 %s356_s12, 4  ;;  %s602_s13 = int_to_ptr.hbm [resolvable:$true] %s601_s13 }
  0x20   : > { %481 = vmatmul.msk.f32.vlgmr.msra.gmra.mxu0 %vm296_vm0, %v291_v6  ;;  %s603_s14 = scalar_lea.hbm %s602_s13, 8  ;;  %s607_s24 = scalar_lea.hbm %s810_s4, 16 }
  0x21   : > { %p604_p1 = scmp.ne.s32.totalorder %s602_s13, %s603_s14  ;;  %p608_p5 = scmp.lt.s32.totalorder %s602_s13, %s810_s4 }
  0x22   : > { %p609_p6 = scmp.lt.s32.totalorder %s607_s24, %s603_s14 }
  0x23   : > { %p605_p2 = pnand %p604_p1, %p740_p4 }
  0x24   : > { %p610_p7 = por %p609_p6, %p608_p5 }
  0x25   : > { %p606_p3 = pneg %p605_p2 }
  0x27   : > { %p611_p9 = pnand %p610_p7, %p606_p3 }
  0x91   : > { %v330_v7 = vpop.permute.xlu0 %329 }
  0x9d   : > { %v317_v9 = vpop.f32.mrf.mxu0 }
  0x9e   : > { %v332_v10 = vmul.f32 %v330_v7, %v317_v9 }
  0xa0   : > { %v337_v11 = vmul.f32 %v556_v8, %v332_v10 }
  0xa2   : > { %338 = vst [vmem:[%s269_s10] sm:$0xff] %v337_v11 }
  0xa3   : > { %614 = shalt.err (!%p611_p9)
}
  0xa4   : > { %490 = dma.vmem_to_hbm [thread:$0]  (%p740_p4), %s354_s11, 128, %s356_s12, %s340_s18  }
  0xa5 PF: > { %p502_p10 = scmp.ge.s32.totalorder %s669_s20, 2  ;;  %s367_s26 = sand.u32 1, %s649_s15  }
  0xa6   : > { %s368_s5 = scalar_lea.sflag [#allocation5], %s367_s26 }
  0xa7   : > { %p497_p11 = pnand %p502_p10, %p747_p8 }
  0xa9   : > { %p498_p12 = pneg %p497_p11 }
  0xab   : > { %644 = dma.done.wait (%p498_p12), %s368_s5, 128  }
  0xac   : > { %646 = vsyncadd (%p498_p12), %s368_s5, 4294967168  ;;  %s18_s20 = sadd.s32 1, %s669_s20   ;;  %s813_s15 = smov %s653_s16 }
  0xad   : > { %p15_p13 = scmp.ge.s32.totalorder %s18_s20, 4   ;;  %s814_s16 = smov %s657_s17 }
  0xae   : > { %s815_s17 = smov %s753_s28  ;;  %s816_s18 = smov %s665_s19 }
  0xaf   : > { %s817_s19 = smov %s819_s23  ;;  %17 = sbr.rel (!%p15_p13) target bundleno = 5 (0x5), region = 91 }
  0xb4   :  { %374 = vsyncpa [#allocation4], 1 }
  0xb5   :  { %376 = vsyncpa [#allocation4 + $0x1], 1 }
  0xb6   :  { %377 = vsyncpa [#allocation5], 1 }
  0xb7   :  { %379 = vsyncpa [#allocation5 + $0x1], 1 }

</bundles_post_ra>
